<compile_context>
chip_gen: v6e
topology: v6e:2x2x1
jax: 0.10.0
libtpu: 0.0.40
codegen_flags: <defaults>
</compile_context>

<pallas_src>
import jax
import jax.numpy as jnp
from jax.experimental import pallas as pl
from jax.experimental.pallas import tpu as pltpu


_SMALL_BYPASS_BYTES = 1 << 20     # below this a plain XLA fill is strictly faster
_TARGET_BLOCK_BYTES = 8 << 20     # ~8 MiB output block per grid step
_VMEM_LIMIT_BYTES = 32 << 20      # room for 2 x 8 MiB double-buffered output on v5e too


def _fill_kernel(val_ref, o_ref):
    # val_ref: SMEM (1,) float32 holding the already clamped exp(inv_std*10).
    # o_ref:   VMEM output tile. Pure store: broadcast-splat the scalar.
    o_ref[...] = jnp.full(o_ref.shape, val_ref[0], dtype=o_ref.dtype)


def _choose_2d_shape(total):
    """Lane-dense (rows, lanes) factorization of the flat output, or None.

    Prefers the widest lane dim dividing `total` (up to 4096) that is a
    multiple of 128; otherwise the largest divisor >= 128 (preferring
    multiples of 8). Returns None when no lane-dense (>=128) factorization
    exists, in which case the caller should use a plain XLA fill.
    """
    if total % 128 == 0:
        for w in (4096, 2048, 1024, 512, 256, 128):
            if total % w == 0:
                return total // w, w
    # total not divisible by 128 -> no divisor can be a multiple of 128.
    limit = min(total, 4096)
    best_any = 0
    best_mult8 = 0
    for w in range(limit, 127, -1):          # only lane widths >= 128
        if total % w == 0:
            if best_any == 0:
                best_any = w
            if w % 8 == 0:
                best_mult8 = w
                break
    w = best_mult8 or best_any
    if w == 0:
        return None
    return total // w, w


def learned_variance_forward(x, inv_std_param):
    """JAX/Pallas equivalent of LearnedVariance.forward.

    x:             any-shape array (only its shape/dtype matter).
    inv_std_param: scalar parameter (the nn.Parameter `_inv_std`).
    """
    orig_shape = x.shape
    orig_dtype = x.dtype
    total = int(x.size)

    # Tiny scalar math in plain JAX; shipped to the kernel via SMEM.
    val = jnp.clip(
        jnp.exp(jnp.asarray(inv_std_param, dtype=jnp.float32) * 10.0),
        1e-6, 1e6,
    )

    if total == 0:
        return jnp.zeros(orig_shape, orig_dtype)

    itemsize = jnp.dtype(orig_dtype).itemsize
    total_bytes = total * itemsize

    shape2d = _choose_2d_shape(total) if total_bytes >= _SMALL_BYPASS_BYTES else None
    if shape2d is None:
        # Tiny output (launch-overhead bound) or no lane-dense factorization:
        # an XLA constant fill is already at the HBM-write roofline.
        return jnp.full(orig_shape, val, dtype=orig_dtype)

    rows, lanes = shape2d

    # Sublane packing of the output dtype: 8 rows (f32), 16 (bf16/fp16), 32 (int8/fp8).
    sublane = max(8, 32 // max(itemsize, 1))

    # Row-tile sized in bytes (~8 MiB per step), sublane-aligned.
    target_rows = max(
        sublane, (_TARGET_BLOCK_BYTES // (lanes * itemsize)) // sublane * sublane
    )
    tr = min(rows, target_rows)
    # Guarantee >=2 grid steps when splittable so v7x's two TensorCores both write.
    while rows > sublane and tr > sublane and pl.cdiv(rows, tr) < 2:
        tr = max(sublane, (tr // 2) // sublane * sublane)

    grid = (pl.cdiv(rows, tr),)

    out2d = pl.pallas_call(
        _fill_kernel,
        out_shape=jax.ShapeDtypeStruct((rows, lanes), orig_dtype),
        grid=grid,
        in_specs=[
            pl.BlockSpec(memory_space=pltpu.MemorySpace.SMEM),  # scalar fill value
        ],
        out_specs=pl.BlockSpec((tr, lanes), lambda i: (i, 0)),
        compiler_params=pltpu.CompilerParams(
            dimension_semantics=("parallel",),
            vmem_limit_bytes=_VMEM_LIMIT_BYTES,
        ),
    )(val.reshape((1,)))

    # Contiguous reshape back to the original shape (layout-free).
    return jnp.reshape(out2d, orig_shape)


if __name__ == "__main__":
    key = jax.random.PRNGKey(0)
    init_val = 0.3  # deterministic init of the learned parameter `_inv_std`
    inv_std_param = jnp.float32(init_val)
    expected_val = jnp.clip(jnp.exp(jnp.float32(init_val) * 10.0), 1e-6, 1e6)

    # 1) Small NCHW-like input -> XLA constant-fill bypass path.
    x_small = jax.random.normal(key, (2, 4, 16, 16), dtype=jnp.float32)
    out_small = jax.block_until_ready(learned_variance_forward(x_small, inv_std_param))
    assert out_small.shape == x_small.shape and out_small.dtype == x_small.dtype
    assert jnp.allclose(out_small, jnp.ones_like(x_small) * expected_val,
                        rtol=1e-6, atol=1e-6)

    # 2) Renderer-sized input (n_rays x n_samples sdf values) -> Pallas path (f32).
    x_rays = jax.random.normal(key, (2048, 256), dtype=jnp.float32)
    out_rays = jax.block_until_ready(learned_variance_forward(x_rays, inv_std_param))
    assert out_rays.shape == x_rays.shape and out_rays.dtype == x_rays.dtype
    assert jnp.allclose(out_rays, jnp.ones_like(x_rays) * expected_val,
                        rtol=1e-6, atol=1e-6)

    # 3) bf16 input -> Pallas path, exercises 16-row sublane alignment.
    x_bf16 = jax.random.normal(key, (2048, 512), dtype=jnp.float32).astype(jnp.bfloat16)
    out_bf16 = jax.block_until_ready(learned_variance_forward(x_bf16, inv_std_param))
    assert out_bf16.shape == x_bf16.shape and out_bf16.dtype == jnp.bfloat16
    ref_bf16 = jnp.full(x_bf16.shape, expected_val).astype(jnp.bfloat16)
    assert jnp.allclose(out_bf16.astype(jnp.float32), ref_bf16.astype(jnp.float32))

    print("KERNEL_OK")
</pallas_src>

<mosaic_0001>
module attributes {stable_mosaic.version = 11 : i64} {
  func.func @_fill_kernel(%arg0: i32, %arg1: memref<1xf32, #tpu.memory_space<smem>>, %arg2: memref<64x4096xf32, #tpu.memory_space<vmem>>) attributes {dimension_semantics = [#tpu.dimension_semantics<parallel>], iteration_bounds = array<i64: 2>, scalar_prefetch = 0 : i64, scratch_operands = 0 : i64, tpu.core_type = #tpu.core_type<tc>, window_params = [{transform_indices = @transform_0, window_bounds = array<i64: 1>}, {transform_indices = @transform_1, window_bounds = array<i64: 64, 4096>}]} {
    %c0 = arith.constant 0 : index
    %0 = memref.load %arg1[%c0] : memref<1xf32, #tpu.memory_space<smem>>
    %1 = vector.broadcast %0 : f32 to vector<64x4096xf32>
    %c0_0 = arith.constant 0 : index
    %c0_1 = arith.constant 0 : index
    %2 = vector.load %arg2[%c0_0, %c0_1] : memref<64x4096xf32, #tpu.memory_space<vmem>>, vector<64x4096xf32>
    tpu.vector_store %arg2[%c0_0, %c0_1], %1 {strides = array<i32>} : memref<64x4096xf32, #tpu.memory_space<vmem>>, vector<64x4096xf32>,
    return
  }
  func.func @transform_0(%arg0: i32) -> i32 {
    %c0_i32 = arith.constant 0 : i32
    %c0_i32_0 = arith.constant 0 : i32
    return %c0_i32 : i32
  }
  func.func @transform_1(%arg0: i32) -> (i32, i32) {
    %c0_i32 = arith.constant 0 : i32
    %c0_i32_0 = arith.constant 0 : i32
    return %arg0, %c0_i32 : i32, i32
  }
}

</mosaic_0001>

<bundles_post_ra>
// kernel: tpu_custom_call.1
= control target key start
LH: loop header
LB: loop body
LE: loop exit
PB: predicated region body
PF: predicated region fallthrough
CT: control target
= control target key end

     0   :  { %s1165_s0 = inlined_call_operand.<no memory space> [shape: f32[1], index: 0, kind: input, shape index: {}]   ;;  %s1166_s1 = inlined_call_operand.hbm [shape: f32[128,4096], index: 1, kind: output, shape index: {}]  }
   0x1   :  { %6 = sst [smem:[#allocation2]] %s1165_s0 }
   0x2   :  { %7 = vsyncpa [#allocation4], 0 }
   0x3   :  { %9 = vsyncpa [#allocation4 + $0x1], 0  ;;  %s551_s8 = smov 0   ;;  %s553_s9 = smov 0  }
   0x4   :  { %s555_s10 = smov 0   ;;  %s557_s11 = smov 0  }
   0x5 LB: > { %s419_s0 = sadd.s32 4294967295, %s533_s11   ;;  %s420_s12 = sadd.s32 4294967294, %s533_s11   ;;  %s533_s11 = sphi %s557_s11, %s1172_s11   ;;  %s529_s10 = sphi %s555_s10, %s1171_s10   ;;  %s525_s9 = sphi %s553_s9, %s1170_s9   ;;  %s521_s8 = sphi %s551_s8, %s1169_s8  }
   0x6   : > { %s574_s13 = sadd.s32 1, %s533_s11   ;;  %s43_s14 = sadd.s32 1, %s529_s10 }
   0x7   : > { %s40_s15 = ssub.s32 %s533_s11, %s574_s13  ;;  %p53_p0 = scmp.ne.s32.totalorder %s529_s10, %s525_s9 }
   0x8   : > { %p41_p1 = scmp.eq.s32.totalorder %s40_s15, 0  ;;  %p54_p2 = scmp.eq.s32.totalorder %s419_s0, 1 }
   0x9   : > { %p59_p3 = scmp.ne.s32.totalorder %s525_s9, %s521_s8  ;;  %p60_p4 = scmp.eq.s32.totalorder %s420_s12, 1 }
   0xa   : > { %s584_s16 = scalar_select %p41_p1, %s529_s10, %s43_s14  }
   0xb   : > { %p586_p5 = por %p54_p2, %p53_p0  ;;  %p590_p6 = por %p60_p4, %p59_p3 }
   0xc   : > { %p422_p7 = scmp.ge.s32.totalorder %s533_s11, 1  ;;  %p81_p8 = scmp.lt.s32.totalorder %s533_s11, 3 }
   0xe   : > { %p82_p9 = pnand %p422_p7, %p81_p8 }
   0xf   : > { %s93_s19 = sand.u32 (!%p82_p9), 1, %s525_s9   ;;  %s97_s20 = sld [smem:[#allocation2]] (!%p82_p9) }
  0x10   : > { %85 = sbr.rel (%p82_p9) target bundleno = 163 (0xa3), region = 24  ;;  %s423_s21 = sshll.u32 (!%p82_p9), %s93_s19, 11 }
  0x11   : > { %s431_s22 = sshll.u32 (!%p82_p9), %s419_s0, 15  ;;  %s599_s23 = scalar_lea.vmem (!%p82_p9), [#allocation3], %s423_s21 }
  0x12   : > { %s370_s24 = sshll.u32 (!%p82_p9), %s599_s23, 4  ;;  %s605_s27 = scalar_lea.hbm (!%p82_p9), %s1166_s1, %s431_s22  ;;  %s607_s24 = int_to_ptr.vmem [resolvable:$true] %s370_s24 }
  0x13   : > { %s1125_s28 = scalar_lea.sflag (!%p82_p9), [#allocation4], %s93_s19  ;;  %s473_s29 = scalar_lea.vmem (!%p82_p9), %s607_s24, 32768 }
  0x14   : > { %p474_p10 = scmp.ne.s32.totalorder (!%p82_p9), %s607_s24, %s473_s29  ;;  %s535_s30 = smov (!%p82_p9), [#allocation3]  }
  0x15   : > { %v609_v0 = vstv %s97_s20  ;;  %s477_s2 = sshll.u32 %s535_s30, 4  ;;  %s478_s2 = int_to_ptr.vmem [resolvable:$false] %s477_s2 }
  0x16   : > { %99 = vst [vmem:[%s599_s23] sm:$0xff] %v609_v0  ;;  %100 = vst [vmem:[%s599_s23 + $0x8] sm:$0xff] %v609_v0  ;;  %p475_p11 = pnand %p474_p10, %p586_p5  ;;  %s479_s3 = scalar_lea.vmem %s478_s2, 65536 }
  0x17   : > { %101 = vst [vmem:[%s599_s23 + $0x10] sm:$0xff] %v609_v0  ;;  %102 = vst [vmem:[%s599_s23 + $0x18] sm:$0xff] %v609_v0  ;;  %p480_p13 = scmp.lt.s32.totalorder %s607_s24, %s478_s2  ;;  %p481_p0 = scmp.lt.s32.totalorder %s479_s3, %s473_s29 }
  0x18   : > { %103 = vst [vmem:[%s599_s23 + $0x20] sm:$0xff] %v609_v0  ;;  %104 = vst [vmem:[%s599_s23 + $0x28] sm:$0xff] %v609_v0  ;;  %p476_p12 = pneg %p475_p11 }
  0x19   : > { %105 = vst [vmem:[%s599_s23 + $0x30] sm:$0xff] %v609_v0  ;;  %106 = vst [vmem:[%s599_s23 + $0x38] sm:$0xff] %v609_v0  ;;  %p482_p1 = por %p481_p0, %p480_p13 }
  0x1a   : > { %107 = vst [vmem:[%s599_s23 + $0x40] sm:$0xff] %v609_v0  ;;  %108 = vst [vmem:[%s599_s23 + $0x48] sm:$0xff] %v609_v0 }
  0x1b   : > { %109 = vst [vmem:[%s599_s23 + $0x50] sm:$0xff] %v609_v0  ;;  %110 = vst [vmem:[%s599_s23 + $0x58] sm:$0xff] %v609_v0  ;;  %p483_p2 = pnand %p482_p1, %p476_p12 }
  0x1c   : > { %111 = vst [vmem:[%s599_s23 + $0x60] sm:$0xff] %v609_v0  ;;  %112 = vst [vmem:[%s599_s23 + $0x68] sm:$0xff] %v609_v0 }
  0x1d   : > { %113 = vst [vmem:[%s599_s23 + $0x70] sm:$0xff] %v609_v0  ;;  %114 = vst [vmem:[%s599_s23 + $0x78] sm:$0xff] %v609_v0 }
  0x1e   : > { %115 = vst [vmem:[%s599_s23 + $0x80] sm:$0xff] %v609_v0  ;;  %116 = vst [vmem:[%s599_s23 + $0x88] sm:$0xff] %v609_v0 }
  0x1f   : > { %117 = vst [vmem:[%s599_s23 + $0x90] sm:$0xff] %v609_v0  ;;  %118 = vst [vmem:[%s599_s23 + $0x98] sm:$0xff] %v609_v0 }
  0x20   : > { %119 = vst [vmem:[%s599_s23 + $0xa0] sm:$0xff] %v609_v0  ;;  %120 = vst [vmem:[%s599_s23 + $0xa8] sm:$0xff] %v609_v0 }
  0x21   : > { %121 = vst [vmem:[%s599_s23 + $0xb0] sm:$0xff] %v609_v0  ;;  %122 = vst [vmem:[%s599_s23 + $0xb8] sm:$0xff] %v609_v0 }
  0x22   : > { %123 = vst [vmem:[%s599_s23 + $0xc0] sm:$0xff] %v609_v0  ;;  %124 = vst [vmem:[%s599_s23 + $0xc8] sm:$0xff] %v609_v0 }
  0x23   : > { %125 = vst [vmem:[%s599_s23 + $0xd0] sm:$0xff] %v609_v0  ;;  %126 = vst [vmem:[%s599_s23 + $0xd8] sm:$0xff] %v609_v0 }
  0x24   : > { %127 = vst [vmem:[%s599_s23 + $0xe0] sm:$0xff] %v609_v0  ;;  %128 = vst [vmem:[%s599_s23 + $0xe8] sm:$0xff] %v609_v0 }
  0x25   : > { %129 = vst [vmem:[%s599_s23 + $0xf0] sm:$0xff] %v609_v0  ;;  %130 = vst [vmem:[%s599_s23 + $0xf8] sm:$0xff] %v609_v0 }
  0x26   : > { %131 = vst [vmem:[%s599_s23 + $0x100] sm:$0xff] %v609_v0  ;;  %132 = vst [vmem:[%s599_s23 + $0x108] sm:$0xff] %v609_v0 }
  0x27   : > { %133 = vst [vmem:[%s599_s23 + $0x110] sm:$0xff] %v609_v0  ;;  %134 = vst [vmem:[%s599_s23 + $0x118] sm:$0xff] %v609_v0 }
  0x28   : > { %135 = vst [vmem:[%s599_s23 + $0x120] sm:$0xff] %v609_v0  ;;  %136 = vst [vmem:[%s599_s23 + $0x128] sm:$0xff] %v609_v0 }
  0x29   : > { %137 = vst [vmem:[%s599_s23 + $0x130] sm:$0xff] %v609_v0  ;;  %138 = vst [vmem:[%s599_s23 + $0x138] sm:$0xff] %v609_v0 }
  0x2a   : > { %139 = vst [vmem:[%s599_s23 + $0x140] sm:$0xff] %v609_v0  ;;  %140 = vst [vmem:[%s599_s23 + $0x148] sm:$0xff] %v609_v0 }
  0x2b   : > { %141 = vst [vmem:[%s599_s23 + $0x150] sm:$0xff] %v609_v0  ;;  %142 = vst [vmem:[%s599_s23 + $0x158] sm:$0xff] %v609_v0 }
  0x2c   : > { %143 = vst [vmem:[%s599_s23 + $0x160] sm:$0xff] %v609_v0  ;;  %144 = vst [vmem:[%s599_s23 + $0x168] sm:$0xff] %v609_v0 }
  0x2d   : > { %145 = vst [vmem:[%s599_s23 + $0x170] sm:$0xff] %v609_v0  ;;  %146 = vst [vmem:[%s599_s23 + $0x178] sm:$0xff] %v609_v0 }
  0x2e   : > { %147 = vst [vmem:[%s599_s23 + $0x180] sm:$0xff] %v609_v0  ;;  %148 = vst [vmem:[%s599_s23 + $0x188] sm:$0xff] %v609_v0 }
  0x2f   : > { %149 = vst [vmem:[%s599_s23 + $0x190] sm:$0xff] %v609_v0  ;;  %150 = vst [vmem:[%s599_s23 + $0x198] sm:$0xff] %v609_v0 }
  0x30   : > { %151 = vst [vmem:[%s599_s23 + $0x1a0] sm:$0xff] %v609_v0  ;;  %152 = vst [vmem:[%s599_s23 + $0x1a8] sm:$0xff] %v609_v0 }
  0x31   : > { %153 = vst [vmem:[%s599_s23 + $0x1b0] sm:$0xff] %v609_v0  ;;  %154 = vst [vmem:[%s599_s23 + $0x1b8] sm:$0xff] %v609_v0 }
  0x32   : > { %155 = vst [vmem:[%s599_s23 + $0x1c0] sm:$0xff] %v609_v0  ;;  %156 = vst [vmem:[%s599_s23 + $0x1c8] sm:$0xff] %v609_v0 }
  0x33   : > { %157 = vst [vmem:[%s599_s23 + $0x1d0] sm:$0xff] %v609_v0  ;;  %158 = vst [vmem:[%s599_s23 + $0x1d8] sm:$0xff] %v609_v0 }
  0x34   : > { %159 = vst [vmem:[%s599_s23 + $0x1e0] sm:$0xff] %v609_v0  ;;  %160 = vst [vmem:[%s599_s23 + $0x1e8] sm:$0xff] %v609_v0 }
  0x35   : > { %161 = vst [vmem:[%s599_s23 + $0x1f0] sm:$0xff] %v609_v0  ;;  %162 = vst [vmem:[%s599_s23 + $0x1f8] sm:$0xff] %v609_v0 }
  0x36   : > { %163 = vst [vmem:[%s599_s23 + $0x200] sm:$0xff] %v609_v0  ;;  %164 = vst [vmem:[%s599_s23 + $0x208] sm:$0xff] %v609_v0 }
  0x37   : > { %165 = vst [vmem:[%s599_s23 + $0x210] sm:$0xff] %v609_v0  ;;  %166 = vst [vmem:[%s599_s23 + $0x218] sm:$0xff] %v609_v0 }
  0x38   : > { %167 = vst [vmem:[%s599_s23 + $0x220] sm:$0xff] %v609_v0  ;;  %168 = vst [vmem:[%s599_s23 + $0x228] sm:$0xff] %v609_v0 }
  0x39   : > { %169 = vst [vmem:[%s599_s23 + $0x230] sm:$0xff] %v609_v0  ;;  %170 = vst [vmem:[%s599_s23 + $0x238] sm:$0xff] %v609_v0 }
  0x3a   : > { %171 = vst [vmem:[%s599_s23 + $0x240] sm:$0xff] %v609_v0  ;;  %172 = vst [vmem:[%s599_s23 + $0x248] sm:$0xff] %v609_v0 }
  0x3b   : > { %173 = vst [vmem:[%s599_s23 + $0x250] sm:$0xff] %v609_v0  ;;  %174 = vst [vmem:[%s599_s23 + $0x258] sm:$0xff] %v609_v0 }
  0x3c   : > { %175 = vst [vmem:[%s599_s23 + $0x260] sm:$0xff] %v609_v0  ;;  %176 = vst [vmem:[%s599_s23 + $0x268] sm:$0xff] %v609_v0 }
  0x3d   : > { %177 = vst [vmem:[%s599_s23 + $0x270] sm:$0xff] %v609_v0  ;;  %178 = vst [vmem:[%s599_s23 + $0x278] sm:$0xff] %v609_v0 }
  0x3e   : > { %179 = vst [vmem:[%s599_s23 + $0x280] sm:$0xff] %v609_v0  ;;  %180 = vst [vmem:[%s599_s23 + $0x288] sm:$0xff] %v609_v0 }
  0x3f   : > { %181 = vst [vmem:[%s599_s23 + $0x290] sm:$0xff] %v609_v0  ;;  %182 = vst [vmem:[%s599_s23 + $0x298] sm:$0xff] %v609_v0 }
  0x40   : > { %183 = vst [vmem:[%s599_s23 + $0x2a0] sm:$0xff] %v609_v0  ;;  %184 = vst [vmem:[%s599_s23 + $0x2a8] sm:$0xff] %v609_v0 }
  0x41   : > { %185 = vst [vmem:[%s599_s23 + $0x2b0] sm:$0xff] %v609_v0  ;;  %186 = vst [vmem:[%s599_s23 + $0x2b8] sm:$0xff] %v609_v0 }
  0x42   : > { %187 = vst [vmem:[%s599_s23 + $0x2c0] sm:$0xff] %v609_v0  ;;  %188 = vst [vmem:[%s599_s23 + $0x2c8] sm:$0xff] %v609_v0 }
  0x43   : > { %189 = vst [vmem:[%s599_s23 + $0x2d0] sm:$0xff] %v609_v0  ;;  %190 = vst [vmem:[%s599_s23 + $0x2d8] sm:$0xff] %v609_v0 }
  0x44   : > { %191 = vst [vmem:[%s599_s23 + $0x2e0] sm:$0xff] %v609_v0  ;;  %192 = vst [vmem:[%s599_s23 + $0x2e8] sm:$0xff] %v609_v0 }
  0x45   : > { %193 = vst [vmem:[%s599_s23 + $0x2f0] sm:$0xff] %v609_v0  ;;  %194 = vst [vmem:[%s599_s23 + $0x2f8] sm:$0xff] %v609_v0 }
  0x46   : > { %195 = vst [vmem:[%s599_s23 + $0x300] sm:$0xff] %v609_v0  ;;  %196 = vst [vmem:[%s599_s23 + $0x308] sm:$0xff] %v609_v0 }
  0x47   : > { %197 = vst [vmem:[%s599_s23 + $0x310] sm:$0xff] %v609_v0  ;;  %198 = vst [vmem:[%s599_s23 + $0x318] sm:$0xff] %v609_v0 }
  0x48   : > { %199 = vst [vmem:[%s599_s23 + $0x320] sm:$0xff] %v609_v0  ;;  %200 = vst [vmem:[%s599_s23 + $0x328] sm:$0xff] %v609_v0 }
  0x49   : > { %201 = vst [vmem:[%s599_s23 + $0x330] sm:$0xff] %v609_v0  ;;  %202 = vst [vmem:[%s599_s23 + $0x338] sm:$0xff] %v609_v0 }
  0x4a   : > { %203 = vst [vmem:[%s599_s23 + $0x340] sm:$0xff] %v609_v0  ;;  %204 = vst [vmem:[%s599_s23 + $0x348] sm:$0xff] %v609_v0 }
  0x4b   : > { %205 = vst [vmem:[%s599_s23 + $0x350] sm:$0xff] %v609_v0  ;;  %206 = vst [vmem:[%s599_s23 + $0x358] sm:$0xff] %v609_v0 }
  0x4c   : > { %207 = vst [vmem:[%s599_s23 + $0x360] sm:$0xff] %v609_v0  ;;  %208 = vst [vmem:[%s599_s23 + $0x368] sm:$0xff] %v609_v0 }
  0x4d   : > { %209 = vst [vmem:[%s599_s23 + $0x370] sm:$0xff] %v609_v0  ;;  %210 = vst [vmem:[%s599_s23 + $0x378] sm:$0xff] %v609_v0 }
  0x4e   : > { %211 = vst [vmem:[%s599_s23 + $0x380] sm:$0xff] %v609_v0  ;;  %212 = vst [vmem:[%s599_s23 + $0x388] sm:$0xff] %v609_v0 }
  0x4f   : > { %213 = vst [vmem:[%s599_s23 + $0x390] sm:$0xff] %v609_v0  ;;  %214 = vst [vmem:[%s599_s23 + $0x398] sm:$0xff] %v609_v0 }
  0x50   : > { %215 = vst [vmem:[%s599_s23 + $0x3a0] sm:$0xff] %v609_v0  ;;  %216 = vst [vmem:[%s599_s23 + $0x3a8] sm:$0xff] %v609_v0 }
  0x51   : > { %217 = vst [vmem:[%s599_s23 + $0x3b0] sm:$0xff] %v609_v0  ;;  %218 = vst [vmem:[%s599_s23 + $0x3b8] sm:$0xff] %v609_v0 }
  0x52   : > { %219 = vst [vmem:[%s599_s23 + $0x3c0] sm:$0xff] %v609_v0  ;;  %220 = vst [vmem:[%s599_s23 + $0x3c8] sm:$0xff] %v609_v0 }
  0x53   : > { %221 = vst [vmem:[%s599_s23 + $0x3d0] sm:$0xff] %v609_v0  ;;  %222 = vst [vmem:[%s599_s23 + $0x3d8] sm:$0xff] %v609_v0 }
  0x54   : > { %223 = vst [vmem:[%s599_s23 + $0x3e0] sm:$0xff] %v609_v0  ;;  %224 = vst [vmem:[%s599_s23 + $0x3e8] sm:$0xff] %v609_v0 }
  0x55   : > { %225 = vst [vmem:[%s599_s23 + $0x3f0] sm:$0xff] %v609_v0  ;;  %226 = vst [vmem:[%s599_s23 + $0x3f8] sm:$0xff] %v609_v0 }
  0x56   : > { %227 = vst [vmem:[%s599_s23 + $0x400] sm:$0xff] %v609_v0  ;;  %228 = vst [vmem:[%s599_s23 + $0x408] sm:$0xff] %v609_v0 }
  0x57   : > { %229 = vst [vmem:[%s599_s23 + $0x410] sm:$0xff] %v609_v0  ;;  %230 = vst [vmem:[%s599_s23 + $0x418] sm:$0xff] %v609_v0 }
  0x58   : > { %231 = vst [vmem:[%s599_s23 + $0x420] sm:$0xff] %v609_v0  ;;  %232 = vst [vmem:[%s599_s23 + $0x428] sm:$0xff] %v609_v0 }
  0x59   : > { %233 = vst [vmem:[%s599_s23 + $0x430] sm:$0xff] %v609_v0  ;;  %234 = vst [vmem:[%s599_s23 + $0x438] sm:$0xff] %v609_v0 }
  0x5a   : > { %235 = vst [vmem:[%s599_s23 + $0x440] sm:$0xff] %v609_v0  ;;  %236 = vst [vmem:[%s599_s23 + $0x448] sm:$0xff] %v609_v0 }
  0x5b   : > { %237 = vst [vmem:[%s599_s23 + $0x450] sm:$0xff] %v609_v0  ;;  %238 = vst [vmem:[%s599_s23 + $0x458] sm:$0xff] %v609_v0 }
  0x5c   : > { %239 = vst [vmem:[%s599_s23 + $0x460] sm:$0xff] %v609_v0  ;;  %240 = vst [vmem:[%s599_s23 + $0x468] sm:$0xff] %v609_v0 }
  0x5d   : > { %241 = vst [vmem:[%s599_s23 + $0x470] sm:$0xff] %v609_v0  ;;  %242 = vst [vmem:[%s599_s23 + $0x478] sm:$0xff] %v609_v0 }
  0x5e   : > { %243 = vst [vmem:[%s599_s23 + $0x480] sm:$0xff] %v609_v0  ;;  %244 = vst [vmem:[%s599_s23 + $0x488] sm:$0xff] %v609_v0 }
  0x5f   : > { %245 = vst [vmem:[%s599_s23 + $0x490] sm:$0xff] %v609_v0  ;;  %246 = vst [vmem:[%s599_s23 + $0x498] sm:$0xff] %v609_v0 }
  0x60   : > { %247 = vst [vmem:[%s599_s23 + $0x4a0] sm:$0xff] %v609_v0  ;;  %248 = vst [vmem:[%s599_s23 + $0x4a8] sm:$0xff] %v609_v0 }
  0x61   : > { %249 = vst [vmem:[%s599_s23 + $0x4b0] sm:$0xff] %v609_v0  ;;  %250 = vst [vmem:[%s599_s23 + $0x4b8] sm:$0xff] %v609_v0 }
  0x62   : > { %251 = vst [vmem:[%s599_s23 + $0x4c0] sm:$0xff] %v609_v0  ;;  %252 = vst [vmem:[%s599_s23 + $0x4c8] sm:$0xff] %v609_v0 }
  0x63   : > { %253 = vst [vmem:[%s599_s23 + $0x4d0] sm:$0xff] %v609_v0  ;;  %254 = vst [vmem:[%s599_s23 + $0x4d8] sm:$0xff] %v609_v0 }
  0x64   : > { %255 = vst [vmem:[%s599_s23 + $0x4e0] sm:$0xff] %v609_v0  ;;  %256 = vst [vmem:[%s599_s23 + $0x4e8] sm:$0xff] %v609_v0 }
  0x65   : > { %257 = vst [vmem:[%s599_s23 + $0x4f0] sm:$0xff] %v609_v0  ;;  %258 = vst [vmem:[%s599_s23 + $0x4f8] sm:$0xff] %v609_v0 }
  0x66   : > { %259 = vst [vmem:[%s599_s23 + $0x500] sm:$0xff] %v609_v0  ;;  %260 = vst [vmem:[%s599_s23 + $0x508] sm:$0xff] %v609_v0 }
  0x67   : > { %261 = vst [vmem:[%s599_s23 + $0x510] sm:$0xff] %v609_v0  ;;  %262 = vst [vmem:[%s599_s23 + $0x518] sm:$0xff] %v609_v0 }
  0x68   : > { %263 = vst [vmem:[%s599_s23 + $0x520] sm:$0xff] %v609_v0  ;;  %264 = vst [vmem:[%s599_s23 + $0x528] sm:$0xff] %v609_v0 }
  0x69   : > { %265 = vst [vmem:[%s599_s23 + $0x530] sm:$0xff] %v609_v0  ;;  %266 = vst [vmem:[%s599_s23 + $0x538] sm:$0xff] %v609_v0 }
  0x6a   : > { %267 = vst [vmem:[%s599_s23 + $0x540] sm:$0xff] %v609_v0  ;;  %268 = vst [vmem:[%s599_s23 + $0x548] sm:$0xff] %v609_v0 }
  0x6b   : > { %269 = vst [vmem:[%s599_s23 + $0x550] sm:$0xff] %v609_v0  ;;  %270 = vst [vmem:[%s599_s23 + $0x558] sm:$0xff] %v609_v0 }
  0x6c   : > { %271 = vst [vmem:[%s599_s23 + $0x560] sm:$0xff] %v609_v0  ;;  %272 = vst [vmem:[%s599_s23 + $0x568] sm:$0xff] %v609_v0 }
  0x6d   : > { %273 = vst [vmem:[%s599_s23 + $0x570] sm:$0xff] %v609_v0  ;;  %274 = vst [vmem:[%s599_s23 + $0x578] sm:$0xff] %v609_v0 }
  0x6e   : > { %275 = vst [vmem:[%s599_s23 + $0x580] sm:$0xff] %v609_v0  ;;  %276 = vst [vmem:[%s599_s23 + $0x588] sm:$0xff] %v609_v0 }
  0x6f   : > { %277 = vst [vmem:[%s599_s23 + $0x590] sm:$0xff] %v609_v0  ;;  %278 = vst [vmem:[%s599_s23 + $0x598] sm:$0xff] %v609_v0 }
  0x70   : > { %279 = vst [vmem:[%s599_s23 + $0x5a0] sm:$0xff] %v609_v0  ;;  %280 = vst [vmem:[%s599_s23 + $0x5a8] sm:$0xff] %v609_v0 }
  0x71   : > { %281 = vst [vmem:[%s599_s23 + $0x5b0] sm:$0xff] %v609_v0  ;;  %282 = vst [vmem:[%s599_s23 + $0x5b8] sm:$0xff] %v609_v0 }
  0x72   : > { %283 = vst [vmem:[%s599_s23 + $0x5c0] sm:$0xff] %v609_v0  ;;  %284 = vst [vmem:[%s599_s23 + $0x5c8] sm:$0xff] %v609_v0 }
  0x73   : > { %285 = vst [vmem:[%s599_s23 + $0x5d0] sm:$0xff] %v609_v0  ;;  %286 = vst [vmem:[%s599_s23 + $0x5d8] sm:$0xff] %v609_v0 }
  0x74   : > { %287 = vst [vmem:[%s599_s23 + $0x5e0] sm:$0xff] %v609_v0  ;;  %288 = vst [vmem:[%s599_s23 + $0x5e8] sm:$0xff] %v609_v0 }
  0x75   : > { %289 = vst [vmem:[%s599_s23 + $0x5f0] sm:$0xff] %v609_v0  ;;  %290 = vst [vmem:[%s599_s23 + $0x5f8] sm:$0xff] %v609_v0 }
  0x76   : > { %291 = vst [vmem:[%s599_s23 + $0x600] sm:$0xff] %v609_v0  ;;  %292 = vst [vmem:[%s599_s23 + $0x608] sm:$0xff] %v609_v0 }
  0x77   : > { %293 = vst [vmem:[%s599_s23 + $0x610] sm:$0xff] %v609_v0  ;;  %294 = vst [vmem:[%s599_s23 + $0x618] sm:$0xff] %v609_v0 }
  0x78   : > { %295 = vst [vmem:[%s599_s23 + $0x620] sm:$0xff] %v609_v0  ;;  %296 = vst [vmem:[%s599_s23 + $0x628] sm:$0xff] %v609_v0 }
  0x79   : > { %297 = vst [vmem:[%s599_s23 + $0x630] sm:$0xff] %v609_v0  ;;  %298 = vst [vmem:[%s599_s23 + $0x638] sm:$0xff] %v609_v0 }
  0x7a   : > { %299 = vst [vmem:[%s599_s23 + $0x640] sm:$0xff] %v609_v0  ;;  %300 = vst [vmem:[%s599_s23 + $0x648] sm:$0xff] %v609_v0 }
  0x7b   : > { %301 = vst [vmem:[%s599_s23 + $0x650] sm:$0xff] %v609_v0  ;;  %302 = vst [vmem:[%s599_s23 + $0x658] sm:$0xff] %v609_v0 }
  0x7c   : > { %303 = vst [vmem:[%s599_s23 + $0x660] sm:$0xff] %v609_v0  ;;  %304 = vst [vmem:[%s599_s23 + $0x668] sm:$0xff] %v609_v0 }
  0x7d   : > { %305 = vst [vmem:[%s599_s23 + $0x670] sm:$0xff] %v609_v0  ;;  %306 = vst [vmem:[%s599_s23 + $0x678] sm:$0xff] %v609_v0 }
  0x7e   : > { %307 = vst [vmem:[%s599_s23 + $0x680] sm:$0xff] %v609_v0  ;;  %308 = vst [vmem:[%s599_s23 + $0x688] sm:$0xff] %v609_v0 }
  0x7f   : > { %309 = vst [vmem:[%s599_s23 + $0x690] sm:$0xff] %v609_v0  ;;  %310 = vst [vmem:[%s599_s23 + $0x698] sm:$0xff] %v609_v0 }
  0x80   : > { %311 = vst [vmem:[%s599_s23 + $0x6a0] sm:$0xff] %v609_v0  ;;  %312 = vst [vmem:[%s599_s23 + $0x6a8] sm:$0xff] %v609_v0 }
  0x81   : > { %313 = vst [vmem:[%s599_s23 + $0x6b0] sm:$0xff] %v609_v0  ;;  %314 = vst [vmem:[%s599_s23 + $0x6b8] sm:$0xff] %v609_v0 }
  0x82   : > { %315 = vst [vmem:[%s599_s23 + $0x6c0] sm:$0xff] %v609_v0  ;;  %316 = vst [vmem:[%s599_s23 + $0x6c8] sm:$0xff] %v609_v0 }
  0x83   : > { %317 = vst [vmem:[%s599_s23 + $0x6d0] sm:$0xff] %v609_v0  ;;  %318 = vst [vmem:[%s599_s23 + $0x6d8] sm:$0xff] %v609_v0 }
  0x84   : > { %319 = vst [vmem:[%s599_s23 + $0x6e0] sm:$0xff] %v609_v0  ;;  %320 = vst [vmem:[%s599_s23 + $0x6e8] sm:$0xff] %v609_v0 }
  0x85   : > { %321 = vst [vmem:[%s599_s23 + $0x6f0] sm:$0xff] %v609_v0  ;;  %322 = vst [vmem:[%s599_s23 + $0x6f8] sm:$0xff] %v609_v0 }
  0x86   : > { %323 = vst [vmem:[%s599_s23 + $0x700] sm:$0xff] %v609_v0  ;;  %324 = vst [vmem:[%s599_s23 + $0x708] sm:$0xff] %v609_v0 }
  0x87   : > { %325 = vst [vmem:[%s599_s23 + $0x710] sm:$0xff] %v609_v0  ;;  %326 = vst [vmem:[%s599_s23 + $0x718] sm:$0xff] %v609_v0 }
  0x88   : > { %327 = vst [vmem:[%s599_s23 + $0x720] sm:$0xff] %v609_v0  ;;  %328 = vst [vmem:[%s599_s23 + $0x728] sm:$0xff] %v609_v0 }
  0x89   : > { %329 = vst [vmem:[%s599_s23 + $0x730] sm:$0xff] %v609_v0  ;;  %330 = vst [vmem:[%s599_s23 + $0x738] sm:$0xff] %v609_v0 }
  0x8a   : > { %331 = vst [vmem:[%s599_s23 + $0x740] sm:$0xff] %v609_v0  ;;  %332 = vst [vmem:[%s599_s23 + $0x748] sm:$0xff] %v609_v0 }
  0x8b   : > { %333 = vst [vmem:[%s599_s23 + $0x750] sm:$0xff] %v609_v0  ;;  %334 = vst [vmem:[%s599_s23 + $0x758] sm:$0xff] %v609_v0 }
  0x8c   : > { %335 = vst [vmem:[%s599_s23 + $0x760] sm:$0xff] %v609_v0  ;;  %336 = vst [vmem:[%s599_s23 + $0x768] sm:$0xff] %v609_v0 }
  0x8d   : > { %337 = vst [vmem:[%s599_s23 + $0x770] sm:$0xff] %v609_v0  ;;  %338 = vst [vmem:[%s599_s23 + $0x778] sm:$0xff] %v609_v0 }
  0x8e   : > { %339 = vst [vmem:[%s599_s23 + $0x780] sm:$0xff] %v609_v0  ;;  %340 = vst [vmem:[%s599_s23 + $0x788] sm:$0xff] %v609_v0 }
  0x8f   : > { %341 = vst [vmem:[%s599_s23 + $0x790] sm:$0xff] %v609_v0  ;;  %342 = vst [vmem:[%s599_s23 + $0x798] sm:$0xff] %v609_v0 }
  0x90   : > { %343 = vst [vmem:[%s599_s23 + $0x7a0] sm:$0xff] %v609_v0  ;;  %344 = vst [vmem:[%s599_s23 + $0x7a8] sm:$0xff] %v609_v0 }
  0x91   : > { %345 = vst [vmem:[%s599_s23 + $0x7b0] sm:$0xff] %v609_v0  ;;  %346 = vst [vmem:[%s599_s23 + $0x7b8] sm:$0xff] %v609_v0 }
  0x92   : > { %347 = vst [vmem:[%s599_s23 + $0x7c0] sm:$0xff] %v609_v0  ;;  %348 = vst [vmem:[%s599_s23 + $0x7c8] sm:$0xff] %v609_v0 }
  0x93   : > { %349 = vst [vmem:[%s599_s23 + $0x7d0] sm:$0xff] %v609_v0  ;;  %350 = vst [vmem:[%s599_s23 + $0x7d8] sm:$0xff] %v609_v0 }
  0x94   : > { %351 = vst [vmem:[%s599_s23 + $0x7e0] sm:$0xff] %v609_v0  ;;  %352 = vst [vmem:[%s599_s23 + $0x7e8] sm:$0xff] %v609_v0 }
  0x95   : > { %353 = vst [vmem:[%s599_s23 + $0x7f0] sm:$0xff] %v609_v0  ;;  %354 = vst [vmem:[%s599_s23 + $0x7f8] sm:$0xff] %v609_v0 }
  0x96   : > { %486 = shalt.err (!%p483_p2)
}
  0x97   : > { %s487_s4 = scalar_lea.hbm %s605_s27, 32768  ;;  %s491_s7 = scalar_lea.hbm %s1166_s1, 65536 }
  0x98   : > { %p488_p3 = scmp.ne.s32.totalorder %s605_s27, %s487_s4  ;;  %p492_p8 = scmp.lt.s32.totalorder %s605_s27, %s1166_s1 }
  0x99   : > { %p493_p9 = scmp.lt.s32.totalorder %s491_s7, %s487_s4 }
  0x9a   : > { %p489_p4 = pnand %p488_p3, %p586_p5 }
  0x9b   : > { %p494_p10 = por %p493_p9, %p492_p8 }
  0x9c   : > { %p490_p7 = pneg %p489_p4 }
  0x9e   : > { %p495_p11 = pnand %p494_p10, %p490_p7 }
  0xa0   : > { %498 = shalt.err (!%p495_p11)
}
  0xa1   : > { %s536_s14 = smov 4096   ;;  %s537_s15 = smov 256  }
  0xa2   : > { %432 = dma.vmem_to_hbm [thread:$0]  (%p586_p5), %s607_s24, 32768, %s605_s27, %s1125_s28, %s536_s14, %s536_s14, %s537_s15  }
  0xa3 PF: > { %p438_p12 = scmp.ge.s32.totalorder %s533_s11, 2  ;;  %s385_s19 = sand.u32 1, %s521_s8  }
  0xa4   : > { %s386_s20 = scalar_lea.sflag [#allocation4], %s385_s19 }
  0xa5   : > { %p435_p13 = pnand %p438_p12, %p590_p6 }
  0xa7   : > { %p436_p0 = pneg %p435_p13 }
  0xa9   : > { %516 = dma.done.wait (%p436_p0), %s386_s20, 32768  }
  0xaa   : > { %518 = vsyncadd (%p436_p0), %s386_s20, 4294934528  ;;  %p12_p1 = scmp.ge.s32.totalorder %s574_s13, 4   ;;  %s1169_s8 = smov %s525_s9 }
  0xab   : > { %s1170_s9 = smov %s529_s10  ;;  %s1171_s10 = smov %s584_s16 }
  0xac   : > { %s1172_s11 = smov %s574_s13  ;;  %14 = sbr.rel (!%p12_p1) target bundleno = 5 (0x5), region = 56 }
  0xb1   :  { %391 = vsyncpa [#allocation4], 1 }
  0xb2   :  { %393 = vsyncpa [#allocation4 + $0x1], 1 }

</bundles_post_ra>
